<compile_context>
chip_gen: v6e
topology: v6e:2x2x1
jax: 0.10.0
libtpu: 0.0.40
codegen_flags: <defaults>
</compile_context>

<pallas_src>
import jax
import jax.numpy as jnp
from jax.experimental import pallas as pl
from jax.experimental.pallas import tpu as pltpu


def _round_up(n, m):
    return ((n + m - 1) // m) * m


def mlp_kernel(x_ref, w1_ref, b1_ref, w2_ref, b2_ref, w3_ref, o_ref):
    # fc1 + ReLU (bf16 operands, f32 accumulation on the MXU)
    x = x_ref[...].astype(jnp.bfloat16)
    h1 = jnp.dot(x, w1_ref[...], preferred_element_type=jnp.float32)
    h1 = jnp.maximum(h1 + b1_ref[...], 0.0)

    # fc2 + ReLU
    h2 = jnp.dot(h1.astype(jnp.bfloat16), w2_ref[...],
                 preferred_element_type=jnp.float32)
    h2 = jnp.maximum(h2 + b2_ref[...], 0.0)

    # fc3 (N=1): VPU multiply + lane reduction instead of a wasted (128,1)
    # MXU pass.  w3_ref is the (1, 128) f32 weight row.
    out = jnp.sum(h2 * w3_ref[...], axis=-1, keepdims=True)
    o_ref[...] = out.astype(o_ref.dtype)


def net_forward(x, params, *, tb=1024):
    """x: (batch, 11) f32.  Returns (batch, 1) f32."""
    w1, b1, w2, b2, w3_row, b3 = params
    batch = x.shape[0]

    # Tile size: multiple of 8 (sublane constraint), capped at the requested tb.
    tb = min(tb, _round_up(batch, 8))
    padded = _round_up(batch, tb)
    if padded != batch:
        x = jnp.pad(x, ((0, padded - batch), (0, 0)))

    grid = (padded // tb,)

    out = pl.pallas_call(
        mlp_kernel,
        out_shape=jax.ShapeDtypeStruct((padded, 1), jnp.float32),
        grid_spec=pltpu.PrefetchScalarGridSpec(
            num_scalar_prefetch=0,
            grid=grid,
            in_specs=[
                # streamed per-tile input
                pl.BlockSpec((tb, 11), lambda i: (i, 0)),
                # resident weights / biases (constant index_map -> DMA'd once)
                pl.BlockSpec((11, 128), lambda i: (0, 0)),
                pl.BlockSpec((1, 128), lambda i: (0, 0)),
                pl.BlockSpec((128, 128), lambda i: (0, 0)),
                pl.BlockSpec((1, 128), lambda i: (0, 0)),
                pl.BlockSpec((1, 128), lambda i: (0, 0)),
            ],
            out_specs=pl.BlockSpec((tb, 1), lambda i: (i, 0)),
        ),
        compiler_params=pltpu.CompilerParams(
            dimension_semantics=("parallel",),
        ),
    )(x, w1, b1, w2, b2, w3_row)

    # Scalar fc3 bias folded into the (cheap) wrapper slice instead of a
    # (1,1) VMEM tile inside the kernel.
    return out[:batch] + b3


def xavier_uniform(key, fan_in, fan_out, shape, dtype=jnp.float32):
    # Matches torch.nn.init.xavier_uniform_ (gain=1): U(-a, a),
    # a = sqrt(6 / (fan_in + fan_out)).
    a = jnp.sqrt(6.0 / (fan_in + fan_out))
    return jax.random.uniform(key, shape, dtype, minval=-a, maxval=a)


def init_params(key):
    k1, k2, k3 = jax.random.split(key, 3)
    # Weights stored transposed relative to PyTorch ((in, out) layout) so the
    # kernel computes x @ W.  fc1/fc2 weights live in HBM as bf16 (MXU dtype);
    # fc3 is kept as an f32 (1, 128) row for the VPU reduction.
    w1 = xavier_uniform(k1, 11, 128, (11, 128)).astype(jnp.bfloat16)
    b1 = jnp.zeros((1, 128), jnp.float32)
    w2 = xavier_uniform(k2, 128, 128, (128, 128)).astype(jnp.bfloat16)
    b2 = jnp.zeros((1, 128), jnp.float32)
    w3_row = xavier_uniform(k3, 128, 1, (1, 128)).astype(jnp.float32)
    b3 = jnp.zeros((1, 1), jnp.float32)
    return (w1, b1, w2, b2, w3_row, b3)


def reference_forward(x, params):
    # Pure-JAX reference mirroring the kernel's bf16-operand / f32-accumulate math.
    w1, b1, w2, b2, w3_row, b3 = params
    h1 = jnp.dot(x.astype(jnp.bfloat16), w1, preferred_element_type=jnp.float32)
    h1 = jnp.maximum(h1 + b1, 0.0)
    h2 = jnp.dot(h1.astype(jnp.bfloat16), w2, preferred_element_type=jnp.float32)
    h2 = jnp.maximum(h2 + b2, 0.0)
    return jnp.sum(h2 * w3_row, axis=-1, keepdims=True) + b3


if __name__ == "__main__":
    key = jax.random.PRNGKey(0)
    k_params, k_x = jax.random.split(key)

    params = init_params(k_params)

    # Small demo batch that still exercises tiling + padding:
    # batch=200, TB=128 -> padded to 256, grid=(2,).
    batch = 200
    x = jax.random.normal(k_x, (batch, 11), jnp.float32)

    out = jax.block_until_ready(net_forward(x, params, tb=128))

    ref = reference_forward(x, params)
    assert out.shape == (batch, 1), out.shape
    assert jnp.allclose(out, ref, atol=1e-2, rtol=1e-2), "mismatch vs reference"

    print("KERNEL_OK")
</pallas_src>

<mosaic_0001>
module attributes {stable_mosaic.version = 11 : i64} {
  func.func @mlp_kernel(%arg0: i32, %arg1: memref<128x11xf32, #tpu.memory_space<vmem>>, %arg2: memref<11x128xbf16, #tpu.memory_space<vmem>>, %arg3: memref<1x128xf32, #tpu.memory_space<vmem>>, %arg4: memref<128x128xbf16, #tpu.memory_space<vmem>>, %arg5: memref<1x128xf32, #tpu.memory_space<vmem>>, %arg6: memref<1x128xf32, #tpu.memory_space<vmem>>, %arg7: memref<128x1xf32, #tpu.memory_space<vmem>>) attributes {dimension_semantics = [#tpu.dimension_semantics<parallel>], iteration_bounds = array<i64: 2>, scalar_prefetch = 0 : i64, scratch_operands = 0 : i64, tpu.core_type = #tpu.core_type<tc>, window_params = [{transform_indices = @transform_0, window_bounds = array<i64: 128, 11>}, {pipeline_mode = #tpu.pipeline_mode<synchronous>, transform_indices = @transform_1, window_bounds = array<i64: 11, 128>}, {pipeline_mode = #tpu.pipeline_mode<synchronous>, transform_indices = @transform_2, window_bounds = array<i64: 1, 128>}, {pipeline_mode = #tpu.pipeline_mode<synchronous>, transform_indices = @transform_3, window_bounds = array<i64: 128, 128>}, {pipeline_mode = #tpu.pipeline_mode<synchronous>, transform_indices = @transform_4, window_bounds = array<i64: 1, 128>}, {pipeline_mode = #tpu.pipeline_mode<synchronous>, transform_indices = @transform_5, window_bounds = array<i64: 1, 128>}, {transform_indices = @transform_6, window_bounds = array<i64: 128, 1>}]} {
    %c0 = arith.constant 0 : index
    %c0_0 = arith.constant 0 : index
    %0 = vector.load %arg1[%c0, %c0_0] : memref<128x11xf32, #tpu.memory_space<vmem>>, vector<128x11xf32>
    %1 = arith.truncf %0 : vector<128x11xf32> to vector<128x11xbf16>
    %c0_1 = arith.constant 0 : index
    %c0_2 = arith.constant 0 : index
    %2 = vector.load %arg2[%c0_1, %c0_2] : memref<11x128xbf16, #tpu.memory_space<vmem>>, vector<11x128xbf16>
    %cst = arith.constant dense<0.000000e+00> : vector<128x128xf32>
    %3 = tpu.matmul %1, %2, %cst {dimension_numbers = #tpu.dot_dimension_numbers<[1], [0], [0], [1], [0, 0, 1, 1], [], []>} : vector<128x11xbf16>, vector<11x128xbf16>, vector<128x128xf32> -> vector<128x128xf32>
    %c0_3 = arith.constant 0 : index
    %c0_4 = arith.constant 0 : index
    %4 = vector.load %arg3[%c0_3, %c0_4] : memref<1x128xf32, #tpu.memory_space<vmem>>, vector<1x128xf32>
    %5 = vector.broadcast %4 : vector<1x128xf32> to vector<128x128xf32>
    %6 = arith.addf %3, %5 : vector<128x128xf32>
    %cst_5 = arith.constant 0.000000e+00 : f32
    %7 = vector.broadcast %cst_5 : f32 to vector<128x128xf32>
    %8 = arith.maximumf %6, %7 : vector<128x128xf32>
    %9 = arith.truncf %8 : vector<128x128xf32> to vector<128x128xbf16>
    %c0_6 = arith.constant 0 : index
    %c0_7 = arith.constant 0 : index
    %10 = vector.load %arg4[%c0_6, %c0_7] : memref<128x128xbf16, #tpu.memory_space<vmem>>, vector<128x128xbf16>
    %cst_8 = arith.constant dense<0.000000e+00> : vector<128x128xf32>
    %11 = tpu.matmul %9, %10, %cst_8 {dimension_numbers = #tpu.dot_dimension_numbers<[1], [0], [0], [1], [0, 0, 1, 1], [], []>} : vector<128x128xbf16>, vector<128x128xbf16>, vector<128x128xf32> -> vector<128x128xf32>
    %c0_9 = arith.constant 0 : index
    %c0_10 = arith.constant 0 : index
    %12 = vector.load %arg5[%c0_9, %c0_10] : memref<1x128xf32, #tpu.memory_space<vmem>>, vector<1x128xf32>
    %13 = vector.broadcast %12 : vector<1x128xf32> to vector<128x128xf32>
    %14 = arith.addf %11, %13 : vector<128x128xf32>
    %cst_11 = arith.constant 0.000000e+00 : f32
    %15 = vector.broadcast %cst_11 : f32 to vector<128x128xf32>
    %16 = arith.maximumf %14, %15 : vector<128x128xf32>
    %c0_12 = arith.constant 0 : index
    %c0_13 = arith.constant 0 : index
    %17 = vector.load %arg6[%c0_12, %c0_13] : memref<1x128xf32, #tpu.memory_space<vmem>>, vector<1x128xf32>
    %18 = vector.broadcast %17 : vector<1x128xf32> to vector<128x128xf32>
    %19 = arith.mulf %16, %18 : vector<128x128xf32>
    %cst_14 = arith.constant dense<0.000000e+00> : vector<128xf32>
    %20 = vector.multi_reduction <add>, %19, %cst_14 [1] : vector<128x128xf32> to vector<128xf32>
    %21 = vector.shape_cast %20 : vector<128xf32> to vector<128x1xf32>
    %c0_15 = arith.constant 0 : index
    %c0_16 = arith.constant 0 : index
    %22 = vector.load %arg7[%c0_15, %c0_16] : memref<128x1xf32, #tpu.memory_space<vmem>>, vector<128x1xf32>
    tpu.vector_store %arg7[%c0_15, %c0_16], %21 {strides = array<i32>} : memref<128x1xf32, #tpu.memory_space<vmem>>, vector<128x1xf32>,
    return
  }
  func.func @transform_0(%arg0: i32) -> (i32, i32) {
    %c0_i32 = arith.constant 0 : i32
    %c0_i32_0 = arith.constant 0 : i32
    return %arg0, %c0_i32 : i32, i32
  }
  func.func @transform_1(%arg0: i32) -> (i32, i32) {
    %c0_i32 = arith.constant 0 : i32
    %c0_i32_0 = arith.constant 0 : i32
    %c0_i32_1 = arith.constant 0 : i32
    return %c0_i32, %c0_i32_0 : i32, i32
  }
  func.func @transform_2(%arg0: i32) -> (i32, i32) {
    %c0_i32 = arith.constant 0 : i32
    %c0_i32_0 = arith.constant 0 : i32
    %c0_i32_1 = arith.constant 0 : i32
    return %c0_i32, %c0_i32_0 : i32, i32
  }
  func.func @transform_3(%arg0: i32) -> (i32, i32) {
    %c0_i32 = arith.constant 0 : i32
    %c0_i32_0 = arith.constant 0 : i32
    %c0_i32_1 = arith.constant 0 : i32
    return %c0_i32, %c0_i32_0 : i32, i32
  }
  func.func @transform_4(%arg0: i32) -> (i32, i32) {
    %c0_i32 = arith.constant 0 : i32
    %c0_i32_0 = arith.constant 0 : i32
    %c0_i32_1 = arith.constant 0 : i32
    return %c0_i32, %c0_i32_0 : i32, i32
  }
  func.func @transform_5(%arg0: i32) -> (i32, i32) {
    %c0_i32 = arith.constant 0 : i32
    %c0_i32_0 = arith.constant 0 : i32
    %c0_i32_1 = arith.constant 0 : i32
    return %c0_i32, %c0_i32_0 : i32, i32
  }
  func.func @transform_6(%arg0: i32) -> (i32, i32) {
    %c0_i32 = arith.constant 0 : i32
    %c0_i32_0 = arith.constant 0 : i32
    return %arg0, %c0_i32 : i32, i32
  }
}

</mosaic_0001>

<bundles_post_ra>
// kernel: tpu_custom_call.1
= control target key start
LH: loop header
LB: loop body
LE: loop exit
PB: predicated region body
PF: predicated region fallthrough
CT: control target
= control target key end

     0   :  { %s943_s21 = smov 0   ;;  %s1099_s0 = inlined_call_operand.vmem [shape: f32[256,11], index: 0, kind: input, shape index: {}]   ;;  %s1100_s1 = inlined_call_operand.vmem [shape: bf16[11,128], index: 1, kind: input, shape index: {}]   ;;  %s1101_s2 = inlined_call_operand.vmem [shape: f32[1,128], index: 2, kind: input, shape index: {}]   ;;  %s1102_s3 = inlined_call_operand.vmem [shape: bf16[128,128], index: 3, kind: input, shape index: {}]   ;;  %s1103_s4 = inlined_call_operand.vmem [shape: f32[1,128], index: 4, kind: input, shape index: {}]   ;;  %s1104_s5 = inlined_call_operand.vmem [shape: f32[1,128], index: 5, kind: input, shape index: {}]   ;;  %s1105_s6 = inlined_call_operand.vmem [shape: f32[256,1], index: 6, kind: output, shape index: {}]  }
   0x1 LB: > { %s759_s22 = sadd.s32 4294967295, %s905_s21   ;;  %p763_p0 = scmp.ge.s32.totalorder %s905_s21, 1  ;;  %s905_s21 = sphi %s943_s21, %s16_s21  }
   0x2   : > { %p213_p1 = scmp.lt.s32.totalorder %s905_s21, 3 }
   0x4   : > { %p214_p2 = pnand %p763_p0, %p213_p1 }
   0x5   : > { %s764_s25 = sshll.u32 (!%p214_p2), %s759_s22, 4 }
   0x6   : > { %217 = sbr.rel (%p214_p2) target bundleno = 598 (0x256), region = 44  ;;  %p244_p3 = scmp.lt.s32.totalorder (!%p214_p2), %s764_s25, 31 }
   0xb   : > { %v890_v0 = vld [vmem:[%s1100_s1] sm:$0x3f]   ;;  %vm319_vm0 = vcmask 1044480   ;;  %vm320_vm1 = vcmask 1045504   ;;  %v891_v1 = vld [vmem:[%s1102_s3 + $0x38] sm:$0xff]   ;;  %v907_v2 = vmov 65535  }
   0xc   : > { %v321_v3 = vsel %vm319_vm0, 4294967295, %v907_v2  ;;  %v892_v5 = vld [vmem:[%s1102_s3 + $0x30] sm:$0xff]   ;;  %865 = vmatprep.subr.bf16.mxu1 %v891_v1  ;;  %s1107_s25 = smov (!%p244_p3, %s764_s25), 31  ;;  %v893_v7 = vld [vmem:[%s1102_s3 + $0x28] sm:$0xff]   ;;  %vm294_vm2 = vcmask 89088   ;;  %v894_v18 = vld [vmem:[%s1102_s3 + $0x20] sm:$0xff]  }
   0xd   : > { %v322_v4 = vsel %vm320_vm1, %v321_v3, 0  ;;  %873 = vmatpush3.bf16.msra.mxu1 %v891_v1  ;;  %s765_s30 = sshll.u32 %s1107_s25, 3  ;;  %v895_v22 = vld [vmem:[%s1102_s3 + $0x18] sm:$0xff]   ;;  %v896_v34 = vld [vmem:[%s1102_s3 + $0x10] sm:$0xff]   ;;  %v897_v35 = vld [vmem:[%s1102_s3 + $0x8] sm:$0xff]   ;;  %vm686_vm3 = vcmask 7168  }
   0xe   : > { %v324_v6 = vand.u32 %v890_v0, %v322_v4  ;;  %866 = vmatprep.subr.bf16.mxu1 %v892_v5  ;;  %s971_s11 = scalar_lea.vmem %s1099_s0, %s765_s30  ;;  %v898_v36 = vld [vmem:[%s1102_s3] sm:$0xff]   ;;  %s1062_s9 = scalar_lea.vmem %s1105_s6, %s765_s30 }
   0xf   : > { %v256_v8 = vld [vmem:[%s971_s11] sm:$0xff]  ;;  %v257_v9 = vld [vmem:[%s971_s11 + $0x8] sm:$0xff]  ;;  %v258_v10 = vld [vmem:[%s971_s11 + $0x10] sm:$0xff] }
  0x10   : > { %815 = vmatprep.subr.bf16.mxu0 %v324_v6  ;;  %v272_v11 = vpack.c.bf16 %v257_v9, %v256_v8  ;;  %v259_v12 = vld [vmem:[%s971_s11 + $0x18] sm:$0xff]  ;;  %v260_v13 = vld [vmem:[%s971_s11 + $0x20] sm:$0xff]  ;;  %v261_v14 = vld [vmem:[%s971_s11 + $0x28] sm:$0xff] }
  0x11   : > { %816 = vmatpush3.bf16.msra.mxu0 %v324_v6  ;;  %874 = vmatpush3.bf16.msra.mxu1 %v892_v5  ;;  %v273_v15 = vpack.c.bf16 %v259_v12, %v258_v10  ;;  %v274_v16 = vpack.c.bf16 %v261_v14, %v260_v13  ;;  %v262_v17 = vld [vmem:[%s971_s11 + $0x30] sm:$0xff]  ;;  %v263_v19 = vld [vmem:[%s971_s11 + $0x38] sm:$0xff]  ;;  %v264_v20 = vld [vmem:[%s971_s11 + $0x40] sm:$0xff] }
  0x12   : > { %833 = vmatprep.subr.bf16.mxu0 %v891_v1  ;;  %867 = vmatprep.subr.bf16.mxu1 %v893_v7  ;;  %v265_v21 = vld [vmem:[%s971_s11 + $0x48] sm:$0xff]  ;;  %v275_v23 = vpack.c.bf16 %v263_v19, %v262_v17  ;;  %v266_v25 = vld [vmem:[%s971_s11 + $0x50] sm:$0xff]  ;;  %v267_v26 = vld [vmem:[%s971_s11 + $0x58] sm:$0xff] }
  0x13   : > { %817 = vmatprep.mubr.msk.bf16.mxu0 %vm294_vm2, %v272_v11  ;;  %v276_v24 = vpack.c.bf16 %v265_v21, %v264_v20  ;;  %v268_v27 = vld [vmem:[%s971_s11 + $0x60] sm:$0xff]  ;;  %v269_v28 = vld [vmem:[%s971_s11 + $0x68] sm:$0xff]  ;;  %v277_v29 = vpack.c.bf16 %v267_v26, %v266_v25  ;;  %v270_v31 = vld [vmem:[%s971_s11 + $0x70] sm:$0xff] }
  0x14   : > { %818 = vmatmul.mubr.msk.bf16.vlgmr.msra.gmra.mxu0 %vm294_vm2, %v273_v15  ;;  %v278_v30 = vpack.c.bf16 %v269_v28, %v268_v27  ;;  %v271_v32 = vld [vmem:[%s971_s11 + $0x78] sm:$0xff]  ;;  %v768_v39 = vld [vmem:[%s1101_s2] ss:$0 sm:$0xff] }
  0x15   : > { %875 = vmatpush3.bf16.msra.mxu1 %v893_v7  ;;  %821 = vmatprep.mubr.msk.bf16.mxu0 %vm294_vm2, %v274_v16  ;;  %v279_v33 = vpack.c.bf16 %v271_v32, %v270_v31 }
  0x16   : > { %834 = vmatpush3.bf16.msra.mxu0 %v891_v1  ;;  %868 = vmatprep.subr.bf16.mxu1 %v894_v18 }
  0x17   : > { %835 = vmatprep.subr.bf16.mxu0 %v892_v5 }
  0x19   : > { %876 = vmatpush3.bf16.msra.mxu1 %v894_v18 }
  0x1a   : > { %836 = vmatpush3.bf16.msra.mxu0 %v892_v5  ;;  %869 = vmatprep.subr.bf16.mxu1 %v895_v22 }
  0x1b   : > { %837 = vmatprep.subr.bf16.mxu0 %v893_v7 }
  0x1c   : > { %822 = vmatmul.mubr.msk.bf16.gmra.mxu0 %vm294_vm2, %v275_v23 }
  0x1d   : > { %877 = vmatpush3.bf16.msra.mxu1 %v895_v22  ;;  %825 = vmatprep.mubr.msk.bf16.mxu0 %vm294_vm2, %v276_v24 }
  0x1e   : > { %838 = vmatpush3.bf16.msra.mxu0 %v893_v7  ;;  %870 = vmatprep.subr.bf16.mxu1 %v896_v34 }
  0x1f   : > { %839 = vmatprep.subr.bf16.mxu0 %v894_v18 }
  0x21   : > { %878 = vmatpush3.bf16.msra.mxu1 %v896_v34 }
  0x22   : > { %840 = vmatpush3.bf16.msra.mxu0 %v894_v18  ;;  %871 = vmatprep.subr.bf16.mxu1 %v897_v35 }
  0x23   : > { %841 = vmatprep.subr.bf16.mxu0 %v895_v22 }
  0x24   : > { %826 = vmatmul.mubr.msk.bf16.gmra.mxu0 %vm294_vm2, %v277_v29 }
  0x25   : > { %829 = vmatprep.mubr.msk.bf16.mxu0 %vm294_vm2, %v278_v30  ;;  %879 = vmatpush3.bf16.msra.mxu1 %v897_v35  ;;  %v1018_v30 = vld [vmem:[%s1103_s4] ss:$0 sm:$0xff] }
  0x26   : > { %842 = vmatpush3.bf16.msra.mxu0 %v895_v22  ;;  %872 = vmatprep.subr.bf16.mxu1 %v898_v36 }
  0x27   : > { %843 = vmatprep.subr.bf16.mxu0 %v896_v34 }
  0x29   : > { %880 = vmatpush3.bf16.msra.mxu1 %v898_v36 }
  0x2a   : > { %844 = vmatpush3.bf16.msra.mxu0 %v896_v34  ;;  %v1024_v34 = vld [vmem:[%s1104_s5] ss:$0 sm:$0xff] }
  0x2b   : > { %845 = vmatprep.subr.bf16.mxu0 %v897_v35 }
  0x2c   : > { %830 = vmatmul.mubr.msk.bf16.gmra.mxu0 %vm294_vm2, %v279_v33 }
  0x2e   : > { %846 = vmatpush3.bf16.msra.mxu0 %v897_v35 }
  0x2f   : > { %847 = vmatprep.subr.bf16.mxu0 %v898_v36 }
  0x32   : > { %848 = vmatpush3.bf16.msra.mxu0 %v898_v36 }
  0xd4   : > { %v819_v37 = vpop.f32.mrf.mxu0 }
  0xd5   : > { %v369_v43 = vadd.f32 %v819_v37, %v768_v39 }
  0xd6   : > { %v360_v38 = vpop.f32.mrf.mxu0 }
  0xd7   : > { %v361_v41 = vadd.f32 %v768_v39, %v360_v38  ;;  %v425_v50 = vmax.f32 %v369_v43, 0.0 }
  0xd8   : > { %v820_v40 = vpop.f32.mrf.mxu0 }
  0xd9   : > { %v372_v42 = vadd.f32 %v820_v40, %v768_v39  ;;  %v423_v48 = vmax.f32 %v361_v41, 0.0 }
  0xda   : > { %v363_v44 = vpop.f32.mrf.mxu0 }
  0xdb   : > { %v364_v45 = vadd.f32 %v768_v39, %v363_v44  ;;  %v426_v46 = vmax.f32 %v372_v42, 0.0 }
  0xdc   : > { %v823_v47 = vpop.f32.mrf.mxu0 }
  0xdd   : > { %v424_v49 = vmax.f32 %v364_v45, 0.0  ;;  %v440_v53 = vpack.c.bf16 %v426_v46, %v425_v50  ;;  %v385_v57 = vadd.f32 %v823_v47, %v768_v39 }
  0xde   : > { %v376_v51 = vpop.f32.mrf.mxu0 }
  0xdf   : > { %v439_v52 = vpack.c.bf16 %v424_v49, %v423_v48  ;;  %v377_v55 = vadd.f32 %v768_v39, %v376_v51  ;;  %v429_v0 = vmax.f32 %v385_v57, 0.0 }
  0xe0   : > { %v824_v54 = vpop.f32.mrf.mxu0 }
  0xe1   : > { %v388_v56 = vadd.f32 %v824_v54, %v768_v39  ;;  %849 = vmatprep.mubr.bf16.mxu0 %v439_v52  ;;  %v427_v62 = vmax.f32 %v377_v55, 0.0 }
  0xe2   : > { %v379_v58 = vpop.f32.mrf.mxu0  ;;  %850 = vmatmul.mubr.bf16.vlgmr.msra.gmra.mxu0 %v440_v53 }
  0xe3   : > { %v380_v59 = vadd.f32 %v768_v39, %v379_v58  ;;  %v430_v60 = vmax.f32 %v388_v56, 0.0 }
  0xe4   : > { %v827_v61 = vpop.f32.mrf.mxu0 }
  0xe5   : > { %v428_v63 = vmax.f32 %v380_v59, 0.0  ;;  %v442_v3 = vpack.c.bf16 %v430_v60, %v429_v0  ;;  %v401_v7 = vadd.f32 %v827_v61, %v768_v39 }
  0xe6   : > { %v392_v1 = vpop.f32.mrf.mxu0 }
  0xe7   : > { %v441_v2 = vpack.c.bf16 %v428_v63, %v427_v62  ;;  %v393_v5 = vadd.f32 %v768_v39, %v392_v1  ;;  %v433_v14 = vmax.f32 %v401_v7, 0.0 }
  0xe8   : > { %v828_v4 = vpop.f32.mrf.mxu0 }
  0xe9   : > { %v404_v6 = vadd.f32 %v828_v4, %v768_v39  ;;  %853 = vmatprep.mubr.bf16.mxu1 %v441_v2  ;;  %v431_v12 = vmax.f32 %v393_v5, 0.0 }
  0xea   : > { %v395_v8 = vpop.f32.mrf.mxu0  ;;  %854 = vmatmul.mubr.bf16.vlgmr.msra.gmra.mxu1 %v442_v3 }
  0xeb   : > { %v396_v9 = vadd.f32 %v768_v39, %v395_v8  ;;  %v434_v10 = vmax.f32 %v404_v6, 0.0 }
  0xec   : > { %v831_v11 = vpop.f32.mrf.mxu0 }
  0xed   : > { %v432_v13 = vmax.f32 %v396_v9, 0.0  ;;  %v444_v17 = vpack.c.bf16 %v434_v10, %v433_v14  ;;  %v417_v21 = vadd.f32 %v831_v11, %v768_v39 }
  0xee   : > { %v408_v15 = vpop.f32.mrf.mxu0 }
  0xef   : > { %v443_v16 = vpack.c.bf16 %v432_v13, %v431_v12  ;;  %v409_v19 = vadd.f32 %v768_v39, %v408_v15  ;;  %v437_v27 = vmax.f32 %v417_v21, 0.0 }
  0xf0   : > { %v832_v18 = vpop.f32.mrf.mxu0 }
  0xf1   : > { %v420_v20 = vadd.f32 %v832_v18, %v768_v39  ;;  %857 = vmatprep.mubr.bf16.mxu1 %v443_v16  ;;  %v435_v25 = vmax.f32 %v409_v19, 0.0 }
  0xf2   : > { %v411_v22 = vpop.f32.mrf.mxu0  ;;  %858 = vmatmul.mubr.bf16.gmra.mxu1 %v444_v17 }
  0xf3   : > { %v412_v23 = vadd.f32 %v768_v39, %v411_v22  ;;  %v438_v24 = vmax.f32 %v420_v20, 0.0 }
  0xf5   : > { %v436_v26 = vmax.f32 %v412_v23, 0.0  ;;  %v446_v29 = vpack.c.bf16 %v438_v24, %v437_v27 }
  0xf7   : > { %v445_v28 = vpack.c.bf16 %v436_v26, %v435_v25 }
  0xf9   : > { %861 = vmatprep.mubr.bf16.mxu1 %v445_v28 }
  0xfa   : > { %862 = vmatmul.mubr.bf16.gmra.mxu1 %v446_v29 }
 0x1a2   : > { %v851_v31 = vpop.f32.mrf.mxu0 }
 0x1a3   : > { %v561_v32 = vadd.f32 %v851_v31, %v1018_v30 }
 0x1a4   : > { %v552_v33 = vpop.f32.mrf.mxu0 }
 0x1a5   : > { %v617_v35 = vmax.f32 %v561_v32, 0.0  ;;  %v553_v36 = vadd.f32 %v1018_v30, %v552_v33 }
 0x1a6   : > { %v852_v37 = vpop.f32.mrf.mxu0 }
 0x1a7   : > { %v615_v38 = vmax.f32 %v553_v36, 0.0  ;;  %v564_v39 = vadd.f32 %v852_v37, %v1018_v30  ;;  %v640_v40 = vmul.f32 %v1024_v34, %v617_v35 }
 0x1a8   : > { %v555_v41 = vpop.f32.mrf.mxu0 }
 0x1a9   : > { %v618_v42 = vmax.f32 %v564_v39, 0.0  ;;  %v556_v43 = vadd.f32 %v1018_v30, %v555_v41  ;;  %658 = vadd.xlane.f32.xlu1 %v640_v40  ;;  %v638_v44 = vmul.f32 %v1024_v34, %v615_v38 }
 0x1aa   : > { %v855_v45 = vpop.f32.mrf.mxu1 }
 0x1ab   : > { %v616_v46 = vmax.f32 %v556_v43, 0.0  ;;  %v577_v47 = vadd.f32 %v855_v45, %v1018_v30  ;;  %654 = vadd.xlane.f32.xlu0 %v638_v44  ;;  %v641_v48 = vmul.f32 %v1024_v34, %v618_v42 }
 0x1ac   : > { %v568_v49 = vpop.f32.mrf.mxu1 }
 0x1ad   : > { %v621_v50 = vmax.f32 %v577_v47, 0.0  ;;  %v569_v51 = vadd.f32 %v1018_v30, %v568_v49  ;;  %660 = vadd.xlane.f32.xlu1 %v641_v48  ;;  %v639_v52 = vmul.f32 %v1024_v34, %v616_v46 }
 0x1ae   : > { %v856_v53 = vpop.f32.mrf.mxu1 }
 0x1af   : > { %v580_v54 = vadd.f32 %v856_v53, %v1018_v30  ;;  %656 = vadd.xlane.f32.xlu0 %v639_v52  ;;  %v619_v56 = vmax.f32 %v569_v51, 0.0  ;;  %v644_v59 = vmul.f32 %v1024_v34, %v621_v50 }
 0x1b0   : > { %v571_v55 = vpop.f32.mrf.mxu1 }
 0x1b1   : > { %v622_v57 = vmax.f32 %v580_v54, 0.0  ;;  %v572_v58 = vadd.f32 %v1018_v30, %v571_v55  ;;  %v642_v3 = vmul.f32 %v1024_v34, %v619_v56 }
 0x1b2   : > { %v859_v60 = vpop.f32.mrf.mxu1 }
 0x1b3   : > { %v620_v61 = vmax.f32 %v572_v58, 0.0  ;;  %v593_v62 = vadd.f32 %v859_v60, %v1018_v30  ;;  %666 = vadd.xlane.f32.xlu0 %v644_v59  ;;  %v645_v63 = vmul.f32 %v1024_v34, %v622_v57 }
 0x1b4   : > { %v584_v0 = vpop.f32.mrf.mxu1 }
 0x1b5   : > { %v625_v1 = vmax.f32 %v593_v62, 0.0  ;;  %v585_v2 = vadd.f32 %v1018_v30, %v584_v0  ;;  %668 = vadd.xlane.f32.xlu1 %v645_v63  ;;  %v643_v6 = vmul.f32 %v1024_v34, %v620_v61 }
 0x1b6   : > { %v860_v4 = vpop.f32.mrf.mxu1 }
 0x1b7   : > { %v596_v5 = vadd.f32 %v860_v4, %v1018_v30  ;;  %662 = vadd.xlane.f32.xlu0 %v642_v3  ;;  %v623_v8 = vmax.f32 %v585_v2, 0.0  ;;  %v648_v11 = vmul.f32 %v1024_v34, %v625_v1 }
 0x1b8   : > { %v587_v7 = vpop.f32.mrf.mxu1 }
 0x1b9   : > { %v626_v9 = vmax.f32 %v596_v5, 0.0  ;;  %v588_v10 = vadd.f32 %v1018_v30, %v587_v7  ;;  %664 = vadd.xlane.f32.xlu1 %v643_v6  ;;  %v646_v18 = vmul.f32 %v1024_v34, %v623_v8 }
 0x1ba   : > { %v863_v12 = vpop.f32.mrf.mxu1 }
 0x1bb   : > { %v624_v13 = vmax.f32 %v588_v10, 0.0  ;;  %674 = vadd.xlane.f32.xlu0 %v648_v11  ;;  %v649_v14 = vmul.f32 %v1024_v34, %v626_v9  ;;  %v609_v16 = vadd.f32 %v863_v12, %v1018_v30 }
 0x1bc   : > { %v600_v15 = vpop.f32.mrf.mxu1 }
 0x1bd   : > { %v601_v17 = vadd.f32 %v1018_v30, %v600_v15  ;;  %676 = vadd.xlane.f32.xlu1 %v649_v14  ;;  %v647_v21 = vmul.f32 %v1024_v34, %v624_v13  ;;  %v629_v23 = vmax.f32 %v609_v16, 0.0 }
 0x1be   : > { %v864_v19 = vpop.f32.mrf.mxu1 }
 0x1bf   : > { %v627_v20 = vmax.f32 %v601_v17, 0.0  ;;  %670 = vadd.xlane.f32.xlu0 %v646_v18  ;;  %v612_v24 = vadd.f32 %v864_v19, %v1018_v30  ;;  %v652_v31 = vmul.f32 %v1024_v34, %v629_v23 }
 0x1c0   : > { %v603_v22 = vpop.f32.mrf.mxu1 }
 0x1c1   : > { %v604_v25 = vadd.f32 %v1018_v30, %v603_v22  ;;  %672 = vadd.xlane.f32.xlu1 %v647_v21  ;;  %v650_v26 = vmul.f32 %v1024_v34, %v627_v20  ;;  %v630_v28 = vmax.f32 %v612_v24, 0.0 }
 0x1c3   : > { %v628_v27 = vmax.f32 %v604_v25, 0.0  ;;  %678 = vadd.xlane.f32.xlu0 %v650_v26  ;;  %v653_v32 = vmul.f32 %v1024_v34, %v630_v28 }
 0x1c5   : > { %v651_v29 = vmul.f32 %v1024_v34, %v628_v27 }
 0x1c7   : > { %680 = vadd.xlane.f32.xlu1 %v651_v29  ;;  %682 = vadd.xlane.f32.xlu0 %v652_v31 }
 0x1cb   : > { %684 = vadd.xlane.f32.xlu1 %v653_v32 }
 0x232   : > { %v659_v30 = vpop.xlane.xlu1 %658 }
 0x233   : > { %689 = vst.msk [vmem:[%s1062_s9 + $0x10] sm:$0xff] %vm686_vm3, %v659_v30 }
 0x234   : > { %v655_v33 = vpop.xlane.xlu0 %654 }
 0x235   : > { %687 = vst.msk [vmem:[%s1062_s9] sm:$0xff] %vm686_vm3, %v655_v33 }
 0x236   : > { %v661_v34 = vpop.xlane.xlu1 %660 }
 0x237   : > { %690 = vst.msk [vmem:[%s1062_s9 + $0x18] sm:$0xff] %vm686_vm3, %v661_v34 }
 0x238   : > { %v657_v35 = vpop.xlane.xlu0 %656 }
 0x239   : > { %688 = vst.msk [vmem:[%s1062_s9 + $0x8] sm:$0xff] %vm686_vm3, %v657_v35 }
 0x23c   : > { %v667_v36 = vpop.xlane.xlu0 %666 }
 0x23d   : > { %693 = vst.msk [vmem:[%s1062_s9 + $0x30] sm:$0xff] %vm686_vm3, %v667_v36 }
 0x23e   : > { %v669_v37 = vpop.xlane.xlu1 %668 }
 0x23f   : > { %694 = vst.msk [vmem:[%s1062_s9 + $0x38] sm:$0xff] %vm686_vm3, %v669_v37 }
 0x240   : > { %v663_v38 = vpop.xlane.xlu0 %662 }
 0x241   : > { %691 = vst.msk [vmem:[%s1062_s9 + $0x20] sm:$0xff] %vm686_vm3, %v663_v38 }
 0x242   : > { %v665_v39 = vpop.xlane.xlu1 %664 }
 0x243   : > { %692 = vst.msk [vmem:[%s1062_s9 + $0x28] sm:$0xff] %vm686_vm3, %v665_v39 }
 0x244   : > { %v675_v40 = vpop.xlane.xlu0 %674 }
 0x245   : > { %697 = vst.msk [vmem:[%s1062_s9 + $0x50] sm:$0xff] %vm686_vm3, %v675_v40 }
 0x246   : > { %v677_v41 = vpop.xlane.xlu1 %676 }
 0x247   : > { %698 = vst.msk [vmem:[%s1062_s9 + $0x58] sm:$0xff] %vm686_vm3, %v677_v41 }
 0x248   : > { %v671_v42 = vpop.xlane.xlu0 %670 }
 0x249   : > { %695 = vst.msk [vmem:[%s1062_s9 + $0x40] sm:$0xff] %vm686_vm3, %v671_v42 }
 0x24a   : > { %v673_v43 = vpop.xlane.xlu1 %672 }
 0x24b   : > { %696 = vst.msk [vmem:[%s1062_s9 + $0x48] sm:$0xff] %vm686_vm3, %v673_v43 }
 0x24c   : > { %v679_v44 = vpop.xlane.xlu0 %678 }
 0x24d   : > { %699 = vst.msk [vmem:[%s1062_s9 + $0x60] sm:$0xff] %vm686_vm3, %v679_v44 }
 0x250   : > { %v681_v45 = vpop.xlane.xlu1 %680  ;;  %v683_v46 = vpop.xlane.xlu0 %682 }
 0x251   : > { %700 = vst.msk [vmem:[%s1062_s9 + $0x68] sm:$0xff] %vm686_vm3, %v681_v45  ;;  %701 = vst.msk [vmem:[%s1062_s9 + $0x70] sm:$0xff] %vm686_vm3, %v683_v46 }
 0x254   : > { %v685_v47 = vpop.xlane.xlu1 %684 }
 0x255   : > { %702 = vst.msk [vmem:[%s1062_s9 + $0x78] sm:$0xff] %vm686_vm3, %v685_v47 }
 0x256 PF: > { %s16_s21 = sadd.s32 1, %s905_s21  }
 0x257   : > { %p13_p4 = scmp.ge.s32.totalorder %s16_s21, 4  }
 0x259   :  { %15 = sbr.rel (!%p13_p4) target bundleno = 1 (0x1), region = 74 }

</bundles_post_ra>
